<compile_context>
chip_gen: v5e
topology: v5e:2x2
jax: 0.10.0
libtpu: 0.0.40
codegen_flags: <defaults>
</compile_context>

<pallas_src>
import functools

import jax
import jax.numpy as jnp
from jax.experimental import pallas as pl
from jax.experimental.pallas import tpu as pltpu


def _round_up(x, m):
    return (x + m - 1) // m * m


def _sublane_mult(dtype):
    # Second-minor block dims must be multiples of 8 (4B), 16 (2B), 32 (1B).
    return max(8, 32 // jnp.dtype(dtype).itemsize)


@functools.lru_cache(maxsize=None)
def _vmem_budget_bytes():
    """~72% of per-core VMEM: ~46 MiB on v7x (64 MiB), ~92 MiB on v5e/v6e (128 MiB)."""
    try:
        cap = int(pltpu.get_tpu_info().vmem_capacity_bytes)
    except Exception:
        cap = 64 << 20  # conservative fallback (v7x-sized part)
    return int(0.72 * cap)


def _block_diag(w, p):
    """blockdiag(w, ..., w), p copies: (K, N) -> (p*K, p*N)."""
    if p == 1:
        return w
    k, n = w.shape
    eye = jnp.eye(p, dtype=w.dtype)
    return jnp.einsum("ab,kn->akbn", eye, w).reshape(p * k, p * n)


def _mlp_kernel(x_ref, w1_ref, b1_ref, w2_ref, b2_ref, o_ref):
    # Cast x to the compute dtype on the VPU (no extra HBM pass in the wrapper).
    x = x_ref[...].astype(w1_ref.dtype)
    # Linear 1 on the MXU with f32 accumulation; bias + ReLU in f32 on the VPU.
    h = jnp.dot(x, w1_ref[...], preferred_element_type=jnp.float32)
    h = jnp.maximum(h + b1_ref[...], 0.0)          # b1 is (1, hidden) -> broadcasts
    # Linear 2 on the MXU with f32 accumulation; single cast at the store.
    y = jnp.dot(h.astype(w2_ref.dtype), w2_ref[...],
                preferred_element_type=jnp.float32)
    o_ref[...] = (y + b2_ref[...]).astype(o_ref.dtype)


@functools.partial(jax.jit,
                   static_argnames=("compute_dtype", "out_dtype", "target_tile_bytes"))
def projection_head_forward(x, w1, b1, w2, b2, *,
                            compute_dtype=jnp.bfloat16,
                            out_dtype=None,
                            target_tile_bytes=1 << 20):
    """y = relu(x @ w1 + b1) @ w2 + b2.

    x: (B, in_dim); w1: (in_dim, hidden); b1: (hidden,); w2: (hidden, out); b2: (out,).
    Matmuls run in `compute_dtype` (bf16 default) with f32 accumulation; bias adds
    and ReLU stay f32.  `out_dtype` defaults to x.dtype (pass bf16 to halve the
    dominant output HBM stream).
    """
    B, in_dim = x.shape
    hidden = w1.shape[1]
    out_dim = w2.shape[1]
    out_dtype = jnp.dtype(out_dtype if out_dtype is not None else x.dtype)

    x_item = jnp.dtype(x.dtype).itemsize
    c_item = jnp.dtype(compute_dtype).itemsize
    o_item = jnp.dtype(out_dtype).itemsize
    row_mult = max(_sublane_mult(x.dtype), _sublane_mult(out_dtype))

    # ---- Lane-dense output: pack `pack` logical rows per stored row. -------
    if out_dim % 128 != 0 and 128 % out_dim == 0 and out_dim >= 16:
        pack = 128 // out_dim
    else:
        pack = 1
        # TODO(synk): out_dim that neither divides nor is a multiple of 128 keeps
        # lane-masked stores; that case would need an in-kernel relayout.

    # Pad x only when B is not a multiple of the tiny packing granule (rare);
    # the common case streams x straight from the caller with no extra HBM pass.
    row_granule = pack * row_mult
    if B % pack != 0 or B < row_granule:
        b_eff = max(_round_up(B, pack), row_granule)
        x = jnp.pad(x, ((0, b_eff - B), (0, 0)))
    else:
        b_eff = B
    R = b_eff // pack                           # packed rows
    pin, phid, pout = pack * in_dim, pack * hidden, pack * out_dim

    x_packed = x.reshape(R, pin)                # free: contiguous row-major bytes

    w1_p = _block_diag(w1.astype(compute_dtype), pack)
    w2_p = _block_diag(w2.astype(compute_dtype), pack)
    b1_p = jnp.tile(b1.astype(jnp.float32), pack).reshape(1, phid)
    b2_p = jnp.tile(b2.astype(jnp.float32), pack).reshape(1, pout)

    # ---- Row-tile sizing: by DMA bytes and a generation-aware VMEM budget. --
    vmem_budget = _vmem_budget_bytes()
    # Weights/biases stay resident; budget assumes default double-buffering.
    # TODO(synk): single-buffer the grid-invariant weight/bias blocks
    # (pipeline_mode=pl.Buffered(1)) once verified on this jax version.
    wgt_bytes = 2 * ((pin * phid + phid * pout) * c_item + (phid + pout) * 4)
    per_row = (2 * pin * x_item                 # x tile (double buffered)
               + pin * c_item                   # in-kernel cast of x
               + phid * (4 + c_item)            # h f32 + h cast for matmul 2
               + pout * 4                       # y f32
               + 2 * pout * o_item)             # out tile (double buffered)
    rows_by_vmem = max(row_mult, (vmem_budget - wgt_bytes - (6 << 20)) // per_row)
    rows_by_dma = max(row_mult, target_tile_bytes // (pin * x_item))
    cap_rows = max(row_mult, min(rows_by_dma, rows_by_vmem))

    nsteps = pl.cdiv(R, cap_rows)
    if nsteps == 1 and R >= 2 * row_mult:
        nsteps = 2      # give the "parallel" row axis >=2 steps (v7x: 2 TensorCores)
    eff_rows = _round_up(pl.cdiv(R, nsteps), row_mult)
    eff_rows = max(row_mult, min(eff_rows, (R // row_mult) * row_mult))
    grid = (pl.cdiv(R, eff_rows),)              # edge block (if any) handled by Pallas

    cost = pl.CostEstimate(
        flops=2 * R * (pin * phid + phid * pout),
        transcendentals=0,
        bytes_accessed=(R * pin * x_item + wgt_bytes // 2 + R * pout * o_item),
    )

    # TODO(synk): for production-size dims (in/hidden in the 2-8K range) switch to
    # a trailing "arbitrary" grid axis over hidden with an f32 VMEM accumulator
    # (stream W1/W2 per tile) instead of resident packed weights.
    out_packed = pl.pallas_call(
        _mlp_kernel,
        out_shape=jax.ShapeDtypeStruct((R, pout), out_dtype),
        grid_spec=pltpu.PrefetchScalarGridSpec(
            num_scalar_prefetch=0,
            grid=grid,
            in_specs=[
                # A tile of packed rows of x per grid step.
                pl.BlockSpec((eff_rows, pin), lambda i: (i, 0)),
                # Weights / biases: full arrays, resident in VMEM across steps.
                pl.BlockSpec((pin, phid), lambda i: (0, 0)),
                pl.BlockSpec((1, phid), lambda i: (0, 0)),
                pl.BlockSpec((phid, pout), lambda i: (0, 0)),
                pl.BlockSpec((1, pout), lambda i: (0, 0)),
            ],
            out_specs=pl.BlockSpec((eff_rows, pout), lambda i: (i, 0)),
        ),
        compiler_params=pltpu.CompilerParams(
            dimension_semantics=("parallel",),
            vmem_limit_bytes=int(vmem_budget),
        ),
        cost_estimate=cost,
    )(x_packed, w1_p, b1_p, w2_p, b2_p)

    out = out_packed.reshape(b_eff, out_dim)    # free: contiguous bytes
    return out[:B] if b_eff != B else out


def init_projection_head_params(key, in_dim, hidden_dim, out_dim, dtype=jnp.float32):
    """Deterministic init matching nn.Linear's default U(-1/sqrt(fan_in), 1/sqrt(fan_in))."""
    k1, k2, k3, k4 = jax.random.split(key, 4)
    bound1 = 1.0 / (in_dim ** 0.5)
    bound2 = 1.0 / (hidden_dim ** 0.5)
    w1 = jax.random.uniform(k1, (in_dim, hidden_dim), dtype, -bound1, bound1)
    b1 = jax.random.uniform(k2, (hidden_dim,), dtype, -bound1, bound1)
    w2 = jax.random.uniform(k3, (hidden_dim, out_dim), dtype, -bound2, bound2)
    b2 = jax.random.uniform(k4, (out_dim,), dtype, -bound2, bound2)
    return w1, b1, w2, b2


def _reference_f32(x, w1, b1, w2, b2):
    h = jnp.maximum(jnp.dot(x, w1, precision="highest") + b1, 0.0)
    return jnp.dot(h, w2, precision="highest") + b2


if __name__ == "__main__":
    # Small shapes consistent with ProjectionHead(in_dim, hidden_dim, out_dim).
    B, IN_DIM, HIDDEN, OUT_DIM = 16, 32, 128, 64

    key = jax.random.PRNGKey(0)
    kx, kp = jax.random.split(key)
    x = jax.random.normal(kx, (B, IN_DIM), jnp.float32)
    w1, b1, w2, b2 = init_projection_head_params(kp, IN_DIM, HIDDEN, OUT_DIM)

    # --- f32 path: check against the pure-JAX reference. ---
    out_f32 = projection_head_forward(x, w1, b1, w2, b2, compute_dtype=jnp.float32)
    jax.block_until_ready(out_f32)
    ref = _reference_f32(x, w1, b1, w2, b2)
    assert out_f32.shape == (B, OUT_DIM)
    assert jnp.allclose(out_f32, ref, atol=2e-3, rtol=2e-3)

    # --- default bf16 path: compare against a bf16-emulating JAX reference. ---
    out_bf16 = projection_head_forward(x, w1, b1, w2, b2)
    jax.block_until_ready(out_bf16)
    h_ref = jnp.maximum(
        jnp.dot(x.astype(jnp.bfloat16), w1.astype(jnp.bfloat16),
                preferred_element_type=jnp.float32) + b1, 0.0)
    ref_bf16 = jnp.dot(h_ref.astype(jnp.bfloat16), w2.astype(jnp.bfloat16),
                       preferred_element_type=jnp.float32) + b2
    assert out_bf16.shape == (B, OUT_DIM)
    assert jnp.allclose(out_bf16, ref_bf16, atol=2e-2, rtol=2e-2)

    # --- batch exercising a multi-step grid with a partial edge block. ---
    B2 = 50
    x2 = jax.random.normal(jax.random.PRNGKey(1), (B2, IN_DIM), jnp.float32)
    out2 = projection_head_forward(x2, w1, b1, w2, b2, compute_dtype=jnp.float32)
    jax.block_until_ready(out2)
    assert out2.shape == (B2, OUT_DIM)
    assert jnp.allclose(out2, _reference_f32(x2, w1, b1, w2, b2), atol=2e-3, rtol=2e-3)

    # --- odd batch exercising the (rare) row-packing pad path. ---
    B3 = 7
    x3 = jax.random.normal(jax.random.PRNGKey(2), (B3, IN_DIM), jnp.float32)
    out3 = projection_head_forward(x3, w1, b1, w2, b2, compute_dtype=jnp.float32)
    jax.block_until_ready(out3)
    assert out3.shape == (B3, OUT_DIM)
    assert jnp.allclose(out3, _reference_f32(x3, w1, b1, w2, b2), atol=2e-3, rtol=2e-3)

    print("KERNEL_OK")
</pallas_src>

<mosaic_0001>
module attributes {stable_mosaic.version = 11 : i64} {
  func.func @_mlp_kernel(%arg0: i32, %arg1: memref<8x64xf32, #tpu.memory_space<vmem>>, %arg2: memref<64x256xf32, #tpu.memory_space<vmem>>, %arg3: memref<1x256xf32, #tpu.memory_space<vmem>>, %arg4: memref<256x128xf32, #tpu.memory_space<vmem>>, %arg5: memref<1x128xf32, #tpu.memory_space<vmem>>, %arg6: memref<8x128xf32, #tpu.memory_space<vmem>>) attributes {dimension_semantics = [#tpu.dimension_semantics<parallel>], iteration_bounds = array<i64: 1>, scalar_prefetch = 0 : i64, scratch_operands = 0 : i64, tpu.core_type = #tpu.core_type<tc>, window_params = [{transform_indices = @transform_0, window_bounds = array<i64: 8, 64>}, {pipeline_mode = #tpu.pipeline_mode<synchronous>, transform_indices = @transform_1, window_bounds = array<i64: 64, 256>}, {pipeline_mode = #tpu.pipeline_mode<synchronous>, transform_indices = @transform_2, window_bounds = array<i64: 1, 256>}, {pipeline_mode = #tpu.pipeline_mode<synchronous>, transform_indices = @transform_3, window_bounds = array<i64: 256, 128>}, {pipeline_mode = #tpu.pipeline_mode<synchronous>, transform_indices = @transform_4, window_bounds = array<i64: 1, 128>}, {transform_indices = @transform_5, window_bounds = array<i64: 8, 128>}]} {
    %c0 = arith.constant 0 : index
    %c0_0 = arith.constant 0 : index
    %0 = vector.load %arg1[%c0, %c0_0] : memref<8x64xf32, #tpu.memory_space<vmem>>, vector<8x64xf32>
    %c0_1 = arith.constant 0 : index
    %c0_2 = arith.constant 0 : index
    %1 = vector.load %arg2[%c0_1, %c0_2] : memref<64x256xf32, #tpu.memory_space<vmem>>, vector<64x256xf32>
    %cst = arith.constant dense<0.000000e+00> : vector<8x256xf32>
    %2 = tpu.matmul %0, %1, %cst {dimension_numbers = #tpu.dot_dimension_numbers<[1], [0], [0], [1], [0, 0, 1, 1], [], []>} : vector<8x64xf32>, vector<64x256xf32>, vector<8x256xf32> -> vector<8x256xf32>
    %c0_3 = arith.constant 0 : index
    %c0_4 = arith.constant 0 : index
    %3 = vector.load %arg3[%c0_3, %c0_4] : memref<1x256xf32, #tpu.memory_space<vmem>>, vector<1x256xf32>
    %4 = vector.broadcast %3 : vector<1x256xf32> to vector<8x256xf32>
    %5 = arith.addf %2, %4 : vector<8x256xf32>
    %cst_5 = arith.constant 0.000000e+00 : f32
    %6 = vector.broadcast %cst_5 : f32 to vector<8x256xf32>
    %7 = arith.maximumf %5, %6 : vector<8x256xf32>
    %c0_6 = arith.constant 0 : index
    %c0_7 = arith.constant 0 : index
    %8 = vector.load %arg4[%c0_6, %c0_7] : memref<256x128xf32, #tpu.memory_space<vmem>>, vector<256x128xf32>
    %cst_8 = arith.constant dense<0.000000e+00> : vector<8x128xf32>
    %9 = tpu.matmul %7, %8, %cst_8 {dimension_numbers = #tpu.dot_dimension_numbers<[1], [0], [0], [1], [0, 0, 1, 1], [], []>} : vector<8x256xf32>, vector<256x128xf32>, vector<8x128xf32> -> vector<8x128xf32>
    %c0_9 = arith.constant 0 : index
    %c0_10 = arith.constant 0 : index
    %10 = vector.load %arg5[%c0_9, %c0_10] : memref<1x128xf32, #tpu.memory_space<vmem>>, vector<1x128xf32>
    %11 = vector.broadcast %10 : vector<1x128xf32> to vector<8x128xf32>
    %12 = arith.addf %9, %11 : vector<8x128xf32>
    %c0_11 = arith.constant 0 : index
    %c0_12 = arith.constant 0 : index
    %13 = vector.load %arg6[%c0_11, %c0_12] : memref<8x128xf32, #tpu.memory_space<vmem>>, vector<8x128xf32>
    tpu.vector_store %arg6[%c0_11, %c0_12], %12 {strides = array<i32>} : memref<8x128xf32, #tpu.memory_space<vmem>>, vector<8x128xf32>,
    return
  }
  func.func @transform_0(%arg0: i32) -> (i32, i32) {
    %c0_i32 = arith.constant 0 : i32
    %c0_i32_0 = arith.constant 0 : i32
    return %arg0, %c0_i32 : i32, i32
  }
  func.func @transform_1(%arg0: i32) -> (i32, i32) {
    %c0_i32 = arith.constant 0 : i32
    %c0_i32_0 = arith.constant 0 : i32
    %c0_i32_1 = arith.constant 0 : i32
    return %c0_i32, %c0_i32_0 : i32, i32
  }
  func.func @transform_2(%arg0: i32) -> (i32, i32) {
    %c0_i32 = arith.constant 0 : i32
    %c0_i32_0 = arith.constant 0 : i32
    %c0_i32_1 = arith.constant 0 : i32
    return %c0_i32, %c0_i32_0 : i32, i32
  }
  func.func @transform_3(%arg0: i32) -> (i32, i32) {
    %c0_i32 = arith.constant 0 : i32
    %c0_i32_0 = arith.constant 0 : i32
    %c0_i32_1 = arith.constant 0 : i32
    return %c0_i32, %c0_i32_0 : i32, i32
  }
  func.func @transform_4(%arg0: i32) -> (i32, i32) {
    %c0_i32 = arith.constant 0 : i32
    %c0_i32_0 = arith.constant 0 : i32
    %c0_i32_1 = arith.constant 0 : i32
    return %c0_i32, %c0_i32_0 : i32, i32
  }
  func.func @transform_5(%arg0: i32) -> (i32, i32) {
    %c0_i32 = arith.constant 0 : i32
    %c0_i32_0 = arith.constant 0 : i32
    return %arg0, %c0_i32 : i32, i32
  }
}

</mosaic_0001>

<bundles_post_ra>
// kernel: tile.18
= control target key start
LH: loop header
LB: loop body
LE: loop exit
PB: predicated region body
PF: predicated region fallthrough
CT: control target
= control target key end

     0   :  { %s22_s0 = inlined_call_operand.vmem [shape: f32[64], index: 0, kind: input, shape index: {}]   ;;  %s23_s1 = inlined_call_operand.vmem [shape: f32[2,64], index: 1, kind: output, shape index: {}]  }
   0x1   :  { %v4_v0 = vld [vmem:[%s22_s0] ss:$0 sm:$0xff] }
   0x2   :  { %5 = vst [vmem:[%s23_s1] sm:$0x3] %v4_v0 }

// kernel: tile.13
= control target key start
LH: loop header
LB: loop body
LE: loop exit
PB: predicated region body
PF: predicated region fallthrough
CT: control target
= control target key end

     0   :  { %s22_s0 = inlined_call_operand.vmem [shape: f32[128], index: 0, kind: input, shape index: {}]   ;;  %s23_s1 = inlined_call_operand.vmem [shape: f32[2,128], index: 1, kind: output, shape index: {}]  }
   0x1   :  { %v4_v0 = vld [vmem:[%s22_s0] ss:$0 sm:$0xff] }
   0x2   :  { %5 = vst [vmem:[%s23_s1] sm:$0x3] %v4_v0 }

// kernel: tile.19
= control target key start
LH: loop header
LB: loop body
LE: loop exit
PB: predicated region body
PF: predicated region fallthrough
CT: control target
= control target key end

     0   :  { %vm7_vm0 = vcmask 523264   ;;  %vm13_vm1 = vcmask 1048064   ;;  %s39_s0 = inlined_call_operand.vmem [shape: f32[2,64], index: 0, kind: input, shape index: {}]   ;;  %s40_s1 = inlined_call_operand.vmem [shape: f32[1,128], index: 1, kind: output, shape index: {}]  }
   0x1   :  { %v4_v0 = vld [vmem:[%s39_s0] sm:$0x3]  ;;  %s22_s0 = smov 64  }
   0x2   :  { %5 = vst [vmem:[#allocation1] sm:$0x3] %v4_v0 }
   0x9   :  { %v10_v1 = vld [vmem:[#allocation1 + $0x1] sm:$0x1]   ;;  %v6_v2 = vld [vmem:[#allocation1] sm:$0x1]  }
   0xa   :  { %11 = vrot.lane.b32.xlu0 %v10_v1, %s22_s0  ;;  %8 = vst.msk [vmem:[#allocation0] sm:$0x1] %vm7_vm0, %v6_v2  }
  0x7c   :  { %v12_v3 = vpop.permute.xlu0 %11  }
  0x7d   :  { %14 = vst.msk [vmem:[#allocation0] sm:$0x1] %vm13_vm1, %v12_v3  }
  0x84   :  { %v17_v4 = vld [vmem:[#allocation0] sm:$0x1] }
  0x85   :  { %20 = vst [vmem:[%s40_s1] sm:$0x1] %v17_v4 }

// kernel: projection_head_forward.1
= control target key start
LH: loop header
LB: loop body
LE: loop exit
PB: predicated region body
PF: predicated region fallthrough
CT: control target
= control target key end

     0   :  { %vm43_vm0 = vcmask 523264   ;;  %s359_s1 = inlined_call_operand.vmem [shape: f32[64,256], index: 1, kind: input, shape index: {}]   ;;  %s360_s3 = inlined_call_operand.vmem [shape: f32[256,128], index: 3, kind: input, shape index: {}]   ;;  %s361_s0 = inlined_call_operand.vmem [shape: f32[8,64], index: 0, kind: input, shape index: {}]   ;;  %s362_s4 = inlined_call_operand.vmem [shape: f32[1,128], index: 4, kind: input, shape index: {}]   ;;  %s363_s2 = inlined_call_operand.vmem [shape: f32[1,256], index: 2, kind: input, shape index: {}]   ;;  %s364_s5 = inlined_call_operand.vmem [shape: f32[8,128], index: 5, kind: output, shape index: {}]  }
   0x1   :  { %v35_v0 = vld [vmem:[%s359_s1 + $0x70] sm:$0xff]  ;;  %v33_v1 = vld [vmem:[%s359_s1 + $0x60] sm:$0xff]  ;;  %v36_v2 = vld [vmem:[%s359_s1 + $0x78] sm:$0xff] }
   0x2   :  { %55 = vmatpush.msra.mxu0 %v35_v0  ;;  %75 = vmatpush.msra.mxu1 %v36_v2  ;;  %v34_v3 = vld [vmem:[%s359_s1 + $0x68] sm:$0xff]  ;;  %v31_v4 = vld [vmem:[%s359_s1 + $0x50] sm:$0xff]  ;;  %v32_v5 = vld [vmem:[%s359_s1 + $0x58] sm:$0xff] }
   0x3   :  { %v29_v6 = vld [vmem:[%s359_s1 + $0x40] sm:$0xff]  ;;  %v30_v7 = vld [vmem:[%s359_s1 + $0x48] sm:$0xff]  ;;  %v27_v8 = vld [vmem:[%s359_s1 + $0x30] sm:$0xff] }
   0x4   :  { %56 = vmatpush.msra.mxu0 %v33_v1  ;;  %76 = vmatpush.msra.mxu1 %v34_v3  ;;  %v104_v9 = vld [vmem:[%s360_s3 + $0x78] sm:$0xff]  ;;  %v103_v11 = vld [vmem:[%s360_s3 + $0x70] sm:$0xff]  ;;  %v102_v13 = vld [vmem:[%s360_s3 + $0x68] sm:$0xff] }
   0x5   :  { %v28_v10 = vld [vmem:[%s359_s1 + $0x38] sm:$0xff]  ;;  %125 = vmatpush.msra.mxu2 %v104_v9  ;;  %v119_v14 = vld [vmem:[%s360_s3 + $0xf0] sm:$0xff]  ;;  %v25_v15 = vld [vmem:[%s359_s1 + $0x20] sm:$0xff] }
   0x6   :  { %57 = vmatpush.msra.mxu0 %v31_v4  ;;  %77 = vmatpush.msra.mxu1 %v32_v5  ;;  %v120_v12 = vld [vmem:[%s360_s3 + $0xf8] sm:$0xff]  ;;  %v26_v16 = vld [vmem:[%s359_s1 + $0x28] sm:$0xff]  ;;  %v101_v17 = vld [vmem:[%s360_s3 + $0x60] sm:$0xff] }
   0x7   :  { %126 = vmatpush.msra.mxu2 %v103_v11  ;;  %145 = vmatpush.msra.mxu3 %v120_v12  ;;  %v118_v18 = vld [vmem:[%s360_s3 + $0xe8] sm:$0xff]  ;;  %v23_v19 = vld [vmem:[%s359_s1 + $0x10] sm:$0xff]  ;;  %v24_v20 = vld [vmem:[%s359_s1 + $0x18] sm:$0xff] }
   0x8   :  { %58 = vmatpush.msra.mxu0 %v29_v6  ;;  %78 = vmatpush.msra.mxu1 %v30_v7  ;;  %v100_v21 = vld [vmem:[%s360_s3 + $0x58] sm:$0xff]  ;;  %v117_v22 = vld [vmem:[%s360_s3 + $0xe0] sm:$0xff]  ;;  %v22_v24 = vld [vmem:[%s359_s1 + $0x8] sm:$0xff] }
   0x9   :  { %127 = vmatpush.msra.mxu2 %v102_v13  ;;  %146 = vmatpush.msra.mxu3 %v119_v14  ;;  %v21_v23 = vld [vmem:[%s359_s1] sm:$0xff]  ;;  %v99_v26 = vld [vmem:[%s360_s3 + $0x50] sm:$0xff]  ;;  %v116_v27 = vld [vmem:[%s360_s3 + $0xd8] sm:$0xff] }
   0xa   :  { %59 = vmatpush.msra.mxu0 %v27_v8  ;;  %79 = vmatpush.msra.mxu1 %v28_v10  ;;  %v20_v25 = vld [vmem:[%s361_s0] sm:$0xff]  ;;  %v98_v28 = vld [vmem:[%s360_s3 + $0x48] sm:$0xff]  ;;  %v115_v29 = vld [vmem:[%s360_s3 + $0xd0] sm:$0xff] }
   0xb   :  { %128 = vmatpush.msra.mxu2 %v101_v17  ;;  %147 = vmatpush.msra.mxu3 %v118_v18  ;;  %v97_v30 = vld [vmem:[%s360_s3 + $0x40] sm:$0xff]  ;;  %v114_v31 = vld [vmem:[%s360_s3 + $0xc8] sm:$0xff]  ;;  %v96_v32 = vld [vmem:[%s360_s3 + $0x38] sm:$0xff] }
   0xc   :  { %60 = vmatpush.msra.mxu0 %v25_v15  ;;  %80 = vmatpush.msra.mxu1 %v26_v16  ;;  %v113_v33 = vld [vmem:[%s360_s3 + $0xc0] sm:$0xff]  ;;  %v95_v34 = vld [vmem:[%s360_s3 + $0x30] sm:$0xff]  ;;  %v112_v35 = vld [vmem:[%s360_s3 + $0xb8] sm:$0xff] }
   0xd   :  { %129 = vmatpush.msra.mxu2 %v100_v21  ;;  %148 = vmatpush.msra.mxu3 %v117_v22  ;;  %v94_v36 = vld [vmem:[%s360_s3 + $0x28] sm:$0xff]  ;;  %v111_v37 = vld [vmem:[%s360_s3 + $0xb0] sm:$0xff]  ;;  %v93_v38 = vld [vmem:[%s360_s3 + $0x20] sm:$0xff] }
   0xe   :  { %61 = vmatpush.msra.mxu0 %v23_v19  ;;  %81 = vmatpush.msra.mxu1 %v24_v20  ;;  %v110_v39 = vld [vmem:[%s360_s3 + $0xa8] sm:$0xff]  ;;  %v92_v40 = vld [vmem:[%s360_s3 + $0x18] sm:$0xff]  ;;  %v109_v41 = vld [vmem:[%s360_s3 + $0xa0] sm:$0xff] }
   0xf   :  { %130 = vmatpush.msra.mxu2 %v99_v26  ;;  %149 = vmatpush.msra.mxu3 %v116_v27  ;;  %v91_v42 = vld [vmem:[%s360_s3 + $0x10] sm:$0xff]  ;;  %v108_v43 = vld [vmem:[%s360_s3 + $0x98] sm:$0xff]  ;;  %v90_v44 = vld [vmem:[%s360_s3 + $0x8] sm:$0xff] }
  0x10   :  { %62 = vmatpush.msra.mxu0 %v21_v23  ;;  %82 = vmatpush.msra.mxu1 %v22_v24  ;;  %v107_v45 = vld [vmem:[%s360_s3 + $0x90] sm:$0xff]  ;;  %v89_v46 = vld [vmem:[%s360_s3] sm:$0xff]  ;;  %v106_v47 = vld [vmem:[%s360_s3 + $0x88] sm:$0xff] }
  0x11   :  { %170 = vmatmul.msk.f32.vlgmr.msra.gmra.mxu0 %vm43_vm0, %v20_v25  ;;  %171 = vmatmul.msk.f32.vlgmr.msra.gmra.mxu1 %vm43_vm0, %v20_v25  ;;  %v105_v48 = vld [vmem:[%s360_s3 + $0x80] sm:$0xff] }
  0x12   :  { %131 = vmatpush.msra.mxu2 %v98_v28  ;;  %150 = vmatpush.msra.mxu3 %v115_v29  ;;  %v37_v49 = vld [vmem:[%s363_s2] sm:$0x3] }
  0x13   :  { %v39_v50 = vperm.slane %v37_v49, 0  ;;  %v40_v51 = vperm.slane %v37_v49, 1  ;;  %v172_v58 = vld [vmem:[%s362_s4] ss:$0 sm:$0xff] }
  0x14   :  { %132 = vmatpush.msra.mxu2 %v97_v30  ;;  %151 = vmatpush.msra.mxu3 %v114_v31 }
  0x16   :  { %133 = vmatpush.msra.mxu2 %v96_v32  ;;  %152 = vmatpush.msra.mxu3 %v113_v33 }
  0x18   :  { %134 = vmatpush.msra.mxu2 %v95_v34  ;;  %153 = vmatpush.msra.mxu3 %v112_v35 }
  0x1a   :  { %135 = vmatpush.msra.mxu2 %v94_v36  ;;  %154 = vmatpush.msra.mxu3 %v111_v37 }
  0x1c   :  { %136 = vmatpush.msra.mxu2 %v93_v38  ;;  %155 = vmatpush.msra.mxu3 %v110_v39 }
  0x1e   :  { %137 = vmatpush.msra.mxu2 %v92_v40  ;;  %156 = vmatpush.msra.mxu3 %v109_v41 }
  0x20   :  { %138 = vmatpush.msra.mxu2 %v91_v42  ;;  %157 = vmatpush.msra.mxu3 %v108_v43 }
  0x22   :  { %139 = vmatpush.msra.mxu2 %v90_v44  ;;  %158 = vmatpush.msra.mxu3 %v107_v45 }
  0x24   :  { %140 = vmatpush.msra.mxu2 %v89_v46  ;;  %159 = vmatpush.msra.mxu3 %v106_v47 }
  0x26   :  { %160 = vmatpush.msra.mxu3 %v105_v48 }
  0x8e   :  { %v64_v52 = vpop.f32.mrf.mxu0  ;;  %v84_v53 = vpop.f32.mrf.mxu1 }
  0x8f   :  { %v65_v54 = vadd.f32 %v64_v52, %v39_v50  ;;  %v85_v55 = vadd.f32 %v84_v53, %v40_v51 }
  0x91   :  { %v87_v56 = vmax.f32 %v65_v54, 0.0  ;;  %v88_v57 = vmax.f32 %v85_v55, 0.0 }
  0x93   :  { %141 = vmatmul.f32.vlgmr.msra.gmra.mxu2 %v87_v56  ;;  %161 = vmatmul.f32.vlgmr.msra.gmra.mxu3 %v88_v57 }
 0x116   :  { %v142_v59 = vpop.f32.mrf.mxu2  ;;  %v162_v60 = vpop.f32.mrf.mxu3 }
 0x117   :  { %v143_v61 = vadd.f32 %v172_v58, %v142_v59 }
 0x119   :  { %v163_v62 = vadd.f32 %v162_v60, %v143_v61 }
 0x11b   :  { %165 = vst [vmem:[%s364_s5] sm:$0xff] %v163_v62 }

</bundles_post_ra>
